<compile_context>
chip_gen: v7x
topology: tpu7x:2x2x1
jax: 0.10.0
libtpu: 0.0.40
codegen_flags: <defaults>
</compile_context>

<pallas_src>
import functools
import math

import jax
import jax.numpy as jnp
import numpy as np
from jax.experimental import pallas as pl
from jax.experimental.pallas import tpu as pltpu


def _gaussian_taps(sigma):
    """Normalized 1D 3-tap Gaussian (separable form of the 3x3 filter)."""
    s = float(sigma)
    if s <= 0.0:
        return 1.0, 0.0  # degenerate Gaussian -> identity denoiser -> loss 0
    e = math.exp(-1.0 / (2.0 * s * s))
    z = 1.0 + 2.0 * e
    return 1.0 / z, e / z  # (center tap, edge tap)


def _edge_weights(h, w, g, ge):
    """(8, g*h*w) f32: rows [wL, wR, wU, wD, 0, 0, 0, 0].

    Each row is the edge tap `ge` except 0 at lanes where the corresponding
    neighbor would fall outside its plane (zero-padding), so a lane roll plus
    a per-lane weight multiply reproduces the zero-padded 3x3 convolution.
    """
    L = h * w
    Lp = g * L
    k = np.arange(Lp)
    j = k % w           # column within the plane (w divides L, so k%L%w == k%w)
    f = k % L           # flattened index within the plane
    out = np.zeros((8, Lp), np.float32)
    out[0] = np.where(j != 0, ge, 0.0)          # left  neighbor valid
    out[1] = np.where(j != w - 1, ge, 0.0)      # right neighbor valid
    out[2] = np.where(f >= w, ge, 0.0)          # up    neighbor valid
    out[3] = np.where(f < L - w, ge, 0.0)       # down  neighbor valid
    return jnp.asarray(out)


def _bm3d_prior_kernel(w_ref, x_ref, out_ref, *, gc, img_w):
    # w_ref:   (8, Lp) f32 edge tap-weight lane vectors.
    # x_ref:   (P, Lp) input block; each sublane row holds g whole flattened
    #          planes laid end-to-end along lanes.
    # out_ref: (8, 128) f32 dense per-block partial-sum tile.
    x = x_ref[...].astype(jnp.float32)
    P, Lp = x.shape

    wl = w_ref[0:1, :]
    wr = w_ref[1:2, :]
    wu = w_ref[2:3, :]
    wd = w_ref[3:4, :]

    # Horizontal pass: +/-1 lane neighbors, edge taps zeroed by wl/wr.
    xl = pltpu.roll(x, shift=1, axis=1)        # xl[:, k] = x[:, k-1]
    xr = pltpu.roll(x, shift=Lp - 1, axis=1)   # xr[:, k] = x[:, k+1]
    hp = gc * x + wl * xl + wr * xr

    # Vertical pass: +/-w lane neighbors (one image row), edge taps via wu/wd.
    xu = pltpu.roll(hp, shift=img_w, axis=1)        # hp one image-row above
    xd = pltpu.roll(hp, shift=Lp - img_w, axis=1)   # hp one image-row below
    den = gc * hp + wu * xu + wd * xd

    # RED prior integrand for this block.
    prod = x * (x - den)

    # Dense (8, 128) partial sum, layout-friendly:
    #   1) reduce sublane groups of 8 (free reshape of the major dim),
    #   2) reduce lane chunks of 128 with tile-aligned static slices.
    acc = jnp.sum(prod.reshape(P // 8, 8, Lp), axis=0)   # (8, Lp)
    s = acc[:, 0:128]
    for j in range(1, Lp // 128):
        s = s + acc[:, j * 128:(j + 1) * 128]
    out_ref[...] = 0.5 * s


def bm3d_prior(target, sigma, epoch=None):
    """Pallas implementation of BM3DPrior.forward(target, epoch) -> scalar loss.

    `epoch` is accepted for API parity with the PyTorch module; it does not
    affect the loss value (as in the reference module).
    """
    del epoch
    n, c, h, w = target.shape
    m = n * c
    L = h * w

    x = jnp.reshape(target, (m, L))            # free (contiguous) reshape
    if not (x.dtype == jnp.float32 or x.dtype == jnp.bfloat16):
        x = x.astype(jnp.float32)
    itemsize = x.dtype.itemsize
    su = 8 * (4 // itemsize)                   # sublane unit: f32 -> 8, bf16 -> 16

    # Pack g whole flattened planes per lane-row so the lane dim is a multiple
    # of 128.  (m, L) -> (m//g, g*L) is another free contiguous reshape.
    g = 128 // math.gcd(L, 128)
    row_unit = su * g
    m_pad = -(-m // row_unit) * row_unit
    if m_pad != m:
        # TODO(synk): only when n*c is not a multiple of su*g; this pad is the
        # one remaining extra copy of the input.
        x = jnp.concatenate([x, jnp.zeros((m_pad - m, L), x.dtype)], axis=0)
    Lp = g * L
    M2 = m_pad // g
    xflat = jnp.reshape(x, (M2, Lp))

    # Block sizing: <= 2 MiB blocks (DMA-efficiency knee, v7x-safe), grid kept
    # >= ~8 parallel steps when there is enough work (megacore sharding).
    total = M2 // su                           # number of su-row units
    unit_bytes = su * Lp * itemsize
    max_block_bytes = 2 * 1024 * 1024
    units_cap = max(1, max_block_bytes // unit_bytes)
    desired = max(1, min(units_cap, max(1, total // 8)))
    u = 1
    for cand in range(min(desired, total), 0, -1):
        if total % cand == 0:                  # exact tiling -> no ragged block
            u = cand
            break
    P = su * u
    grid = total // u
    block_bytes = P * Lp * itemsize
    vmem_limit = int(min(64 * 2 ** 20,
                         max(32 * 2 ** 20, 6 * block_bytes + 2 * 2 ** 20)))
    # TODO(synk): a single su-row plane group larger than the VMEM budget
    # (very large h*w) would need row-chunk tiling with a halo; not implemented.

    gc, ge = _gaussian_taps(sigma)
    wts = _edge_weights(h, w, g, ge)
    kernel = functools.partial(_bm3d_prior_kernel, gc=gc, img_w=w)

    partials = pl.pallas_call(
        kernel,
        out_shape=jax.ShapeDtypeStruct((grid * 8, 128), jnp.float32),
        grid=(grid,),
        in_specs=[
            pl.BlockSpec((8, Lp), lambda i: (0, 0)),     # tap weights (tiny)
            pl.BlockSpec((P, Lp), lambda i: (i, 0)),     # data block
        ],
        out_specs=pl.BlockSpec((8, 128), lambda i: (i, 0)),
        compiler_params=pltpu.CompilerParams(
            dimension_semantics=("parallel",),
            vmem_limit_bytes=vmem_limit),
    )(wts, xflat)
    return jnp.sum(partials)


def bm3d_prior_ref(target, sigma):
    """Pure numpy reference of the same surrogate loss, for validation."""
    x = np.asarray(target, dtype=np.float32)
    ax = np.array([-1.0, 0.0, 1.0], dtype=np.float64)
    g1 = np.exp(-ax ** 2 / (2.0 * float(sigma) ** 2))
    k = np.outer(g1, g1)
    k = (k / k.sum()).astype(np.float32)
    n, c, h, w = x.shape
    xp = np.pad(x, ((0, 0), (0, 0), (1, 1), (1, 1)))
    den = np.zeros_like(x)
    for di in range(3):
        for dj in range(3):
            den += k[di, dj] * xp[:, :, di:di + h, dj:dj + w]
    return 0.5 * np.sum(x * (x - den))


if __name__ == "__main__":
    key = jax.random.PRNGKey(0)
    target = jax.random.normal(key, (2, 4, 16, 16), dtype=jnp.float32)
    sigma = 1.5
    epoch = 0

    loss = bm3d_prior(target, sigma, epoch)
    loss = jax.block_until_ready(loss)

    ref = bm3d_prior_ref(np.asarray(target), sigma)
    assert np.allclose(np.asarray(loss), ref, rtol=1e-4, atol=1e-4), (
        float(loss), float(ref))
    print("KERNEL_OK")
</pallas_src>

<mosaic_0001>
module attributes {stable_mosaic.version = 11 : i64} {
  func.func @_bm3d_prior_kernel(%arg0: i32, %arg1: memref<8x256xf32, #tpu.memory_space<vmem>>, %arg2: memref<8x256xf32, #tpu.memory_space<vmem>>, %arg3: memref<8x128xf32, #tpu.memory_space<vmem>>) attributes {dimension_semantics = [#tpu.dimension_semantics<parallel>], iteration_bounds = array<i64: 1>, scalar_prefetch = 0 : i64, scratch_operands = 0 : i64, tpu.core_type = #tpu.core_type<tc>, window_params = [{pipeline_mode = #tpu.pipeline_mode<synchronous>, transform_indices = @transform_0, window_bounds = array<i64: 8, 256>}, {transform_indices = @transform_1, window_bounds = array<i64: 8, 256>}, {transform_indices = @transform_2, window_bounds = array<i64: 8, 128>}]} {
    %c0 = arith.constant 0 : index
    %c0_0 = arith.constant 0 : index
    %0 = vector.load %arg2[%c0, %c0_0] : memref<8x256xf32, #tpu.memory_space<vmem>>, vector<8x256xf32>
    %c0_1 = arith.constant 0 : index
    %c0_2 = arith.constant 0 : index
    %1 = vector.load %arg1[%c0_1, %c0_2] : memref<8x256xf32, #tpu.memory_space<vmem>>, vector<1x256xf32>
    %c1 = arith.constant 1 : index
    %c0_3 = arith.constant 0 : index
    %2 = vector.load %arg1[%c1, %c0_3] : memref<8x256xf32, #tpu.memory_space<vmem>>, vector<1x256xf32>
    %c2 = arith.constant 2 : index
    %c0_4 = arith.constant 0 : index
    %3 = vector.load %arg1[%c2, %c0_4] : memref<8x256xf32, #tpu.memory_space<vmem>>, vector<1x256xf32>
    %c3 = arith.constant 3 : index
    %c0_5 = arith.constant 0 : index
    %4 = vector.load %arg1[%c3, %c0_5] : memref<8x256xf32, #tpu.memory_space<vmem>>, vector<1x256xf32>
    %c1_i32 = arith.constant 1 : i32
    %5 = tpu.dynamic_rotate %0 by %c1_i32 dim 1 : vector<8x256xf32>, i32 -> vector<8x256xf32>
    %c255_i32 = arith.constant 255 : i32
    %6 = tpu.dynamic_rotate %0 by %c255_i32 dim 1 : vector<8x256xf32>, i32 -> vector<8x256xf32>
    %cst = arith.constant 0.384397328 : f32
    %7 = vector.broadcast %cst : f32 to vector<8x256xf32>
    %8 = arith.mulf %7, %0 : vector<8x256xf32>
    %9 = vector.broadcast %1 : vector<1x256xf32> to vector<8x256xf32>
    %10 = arith.mulf %9, %5 : vector<8x256xf32>
    %11 = arith.addf %8, %10 : vector<8x256xf32>
    %12 = vector.broadcast %2 : vector<1x256xf32> to vector<8x256xf32>
    %13 = arith.mulf %12, %6 : vector<8x256xf32>
    %14 = arith.addf %11, %13 : vector<8x256xf32>
    %c16_i32 = arith.constant 16 : i32
    %15 = tpu.dynamic_rotate %14 by %c16_i32 dim 1 : vector<8x256xf32>, i32 -> vector<8x256xf32>
    %c240_i32 = arith.constant 240 : i32
    %16 = tpu.dynamic_rotate %14 by %c240_i32 dim 1 : vector<8x256xf32>, i32 -> vector<8x256xf32>
    %cst_6 = arith.constant 0.384397328 : f32
    %17 = vector.broadcast %cst_6 : f32 to vector<8x256xf32>
    %18 = arith.mulf %17, %14 : vector<8x256xf32>
    %19 = vector.broadcast %3 : vector<1x256xf32> to vector<8x256xf32>
    %20 = arith.mulf %19, %15 : vector<8x256xf32>
    %21 = arith.addf %18, %20 : vector<8x256xf32>
    %22 = vector.broadcast %4 : vector<1x256xf32> to vector<8x256xf32>
    %23 = arith.mulf %22, %16 : vector<8x256xf32>
    %24 = arith.addf %21, %23 : vector<8x256xf32>
    %25 = arith.subf %0, %24 : vector<8x256xf32>
    %26 = arith.mulf %0, %25 : vector<8x256xf32>
    %27 = vector.shape_cast %26 : vector<8x256xf32> to vector<1x8x256xf32>
    %cst_7 = arith.constant dense<0.000000e+00> : vector<8x256xf32>
    %28 = vector.multi_reduction <add>, %27, %cst_7 [0] : vector<1x8x256xf32> to vector<8x256xf32>
    %29 = vector.extract_strided_slice %28 {offsets = [0, 0], sizes = [8, 128], strides = [1, 1]} : vector<8x256xf32> to vector<8x128xf32>
    %30 = vector.extract_strided_slice %28 {offsets = [0, 128], sizes = [8, 128], strides = [1, 1]} : vector<8x256xf32> to vector<8x128xf32>
    %31 = arith.addf %29, %30 : vector<8x128xf32>
    %cst_8 = arith.constant 5.000000e-01 : f32
    %32 = vector.broadcast %cst_8 : f32 to vector<8x128xf32>
    %33 = arith.mulf %32, %31 : vector<8x128xf32>
    %c0_9 = arith.constant 0 : index
    %c0_10 = arith.constant 0 : index
    %34 = vector.load %arg3[%c0_9, %c0_10] : memref<8x128xf32, #tpu.memory_space<vmem>>, vector<8x128xf32>
    tpu.vector_store %arg3[%c0_9, %c0_10], %33 {strides = array<i32>} : memref<8x128xf32, #tpu.memory_space<vmem>>, vector<8x128xf32>,
    return
  }
  func.func @transform_0(%arg0: i32) -> (i32, i32) {
    %c0_i32 = arith.constant 0 : i32
    %c0_i32_0 = arith.constant 0 : i32
    %c0_i32_1 = arith.constant 0 : i32
    return %c0_i32, %c0_i32_0 : i32, i32
  }
  func.func @transform_1(%arg0: i32) -> (i32, i32) {
    %c0_i32 = arith.constant 0 : i32
    %c0_i32_0 = arith.constant 0 : i32
    return %arg0, %c0_i32 : i32, i32
  }
  func.func @transform_2(%arg0: i32) -> (i32, i32) {
    %c0_i32 = arith.constant 0 : i32
    %c0_i32_0 = arith.constant 0 : i32
    return %arg0, %c0_i32 : i32, i32
  }
}

</mosaic_0001>

<bundles_post_ra>
// kernel: tpu_custom_call.1
= control target key start
LH: loop header
LB: loop body
LE: loop exit
PB: predicated region body
PF: predicated region fallthrough
CT: control target
= control target key end

     0   :  { %7 = vsyncpa [#allocation3], 0  ;;  %s315_s0 = inlined_call_operand.hbm [shape: f32[8,256], index: 0, kind: input, shape index: {}]   ;;  %s316_s1 = inlined_call_operand.hbm [shape: f32[8,256], index: 1, kind: input, shape index: {}]   ;;  %s317_s2 = inlined_call_operand.hbm [shape: f32[8,128], index: 2, kind: output, shape index: {}]  }
   0x1   :  { %8 = vsyncpa [#allocation6], 0 }
   0x2   :  { %9 = vsyncpa [#allocation4], 0  ;;  %s243_s9 = smov [#allocation2]   ;;  %s244_s11 = smov [#allocation5]  }
   0x3   :  { %s16_s10 = sshll.u32 %s243_s9, 4  ;;  %s26_s12 = sshll.u32 %s244_s11, 4  ;;  %s17_s10 = int_to_ptr.vmem [resolvable:$true] %s16_s10  ;;  %s27_s12 = int_to_ptr.vmem [resolvable:$true] %s26_s12 }
   0x4   :  { %s171_s15 = scalar_lea.hbm %s315_s0, 256 }
   0x5   :  { %p172_p0 = scmp.ne.s32.totalorder %s315_s0, %s171_s15  ;;  %p175_p1 = scmp.lt.u32.totalorder %s171_s15, %s315_s0 }
   0x7   :  { %p177_p2 = pnand %p175_p1, %p172_p0 }
   0x9   :  { %180 = shalt.err (!%p177_p2)
}
   0xa   :  { %s181_s20 = scalar_lea.vmem %s17_s10, 256  ;;  %p186_p4 = scmp.lt.s32.totalorder %s17_s10, %s17_s10 }
   0xb   :  { %p182_p3 = scmp.ne.s32.totalorder %s17_s10, %s181_s20  ;;  %p187_p5 = scmp.lt.s32.totalorder %s181_s20, %s181_s20 }
   0xd   :  { %p188_p6 = por %p187_p5, %p186_p4 }
   0xf   :  { %p189_p7 = pnand %p188_p6, %p182_p3 }
  0x11   :  { %192 = shalt.err (!%p189_p7)
}
  0x12   :  { %19 = dma.hbm_to_vmem [thread:$0]  %s315_s0, 256, %s17_s10, [#allocation3]  }
  0x13   :  { %s193_s25 = scalar_lea.hbm %s316_s1, 256 }
  0x14   :  { %p194_p8 = scmp.ne.s32.totalorder %s316_s1, %s193_s25  ;;  %p197_p9 = scmp.lt.u32.totalorder %s193_s25, %s316_s1 }
  0x16   :  { %p199_p10 = pnand %p197_p9, %p194_p8 }
  0x18   :  { %202 = shalt.err (!%p199_p10)
}
  0x19   :  { %s203_s30 = scalar_lea.vmem %s27_s12, 256  ;;  %p208_p12 = scmp.lt.s32.totalorder %s27_s12, %s27_s12 }
  0x1a   :  { %p204_p11 = scmp.ne.s32.totalorder %s27_s12, %s203_s30  ;;  %p209_p13 = scmp.lt.s32.totalorder %s203_s30, %s203_s30 }
  0x1c   :  { %p210_p0 = por %p209_p13, %p208_p12 }
  0x1e   :  { %p211_p1 = pnand %p210_p0, %p204_p11 }
  0x20   :  { %214 = shalt.err (!%p211_p1)
}
  0x21   :  { %29 = dma.hbm_to_vmem [thread:$0]  %s316_s1, 256, %s27_s12, [#allocation6]  }
  0x22   :  { %237 = dma.done.wait [#allocation3], 256  }
  0x23   :  { %238 = vsyncadd [#allocation3], 4294967040 }
  0x24   :  { %239 = dma.done.wait [#allocation6], 256  }
  0x25   :  { %240 = vsyncadd [#allocation6], 4294967040  ;;  %v289_v0 = vld [vmem:[#allocation5] sm:$0xff]  ;;  %s245_s4 = smov 127   ;;  %s246_s5 = smov 1   ;;  %v293_v1 = vld [vmem:[#allocation5 + $0x8] sm:$0xff]  ;;  %v49_v2 = vlaneseq }
  0x26   :  { %54 = vrot.lane.b32.xlu1 %v289_v0, %s245_s4  ;;  %45 = vrot.lane.b32.xlu0 %v289_v0, %s246_s5  ;;  %v38_v7 = vld [vmem:[#allocation2] ss:$8 sm:$0x3]  ;;  %v40_v10 = vld [vmem:[#allocation2 + $0x1] ss:$8 sm:$0x3] }
  0x27   :  { %v65_v3 = vshrl.u32 %v49_v2, 7  ;;  %v50_v4 = vand.u32 127, %v49_v2  ;;  %v62_v16 = vmul.f32 0.38439733, %v293_v1  ;;  %v61_v18 = vmul.f32 0.38439733, %v289_v0 }
  0x28   :  { %s247_s1 = smov 16   ;;  %s248_s6 = smov 112   ;;  %v42_v31 = vld [vmem:[#allocation2 + $0x2] ss:$8 sm:$0x3] }
  0x29   :  { %v66_v5 = vsub.s32 0, %v65_v3  ;;  %v70_v6 = vsub.s32 1, %v65_v3  ;;  %vm58_vm0 = vcmp.lt.s32.totalorder %v50_v4, 127  ;;  %vm51_vm1 = vcmp.lt.s32.totalorder %v50_v4, 1  ;;  %s249_s7 = smov [#allocation7]  }
  0x2a   :  { %56 = vrot.lane.b32.xlu1 %v293_v1, %s245_s4  ;;  %47 = vrot.lane.b32.xlu0 %v293_v1, %s246_s5  ;;  %vm97_vm2 = vcmp.lt.s32.totalorder %v50_v4, 16  ;;  %v44_v34 = vld [vmem:[#allocation2 + $0x3] ss:$8 sm:$0x3]  ;;  %vm104_vm3 = vcmp.lt.s32.totalorder %v50_v4, 112  ;;  %s154_s8 = sshll.u32 %s249_s7, 4  ;;  %s155_s8 = int_to_ptr.vmem [resolvable:$true] %s154_s8 }
  0x2b   :  { %v67_v11 = vrot.slane %v38_v7, %v66_v5  ;;  %v71_v12 = vrot.slane %v38_v7, %v70_v6  ;;  %v82_v13 = vrot.slane %v40_v10, %v66_v5  ;;  %v86_v14 = vrot.slane %v40_v10, %v70_v6  ;;  %s215_s9 = scalar_lea.vmem %s155_s8, 128  ;;  %p220_p3 = scmp.lt.s32.totalorder %s155_s8, %s155_s8 }
  0x2c   :  { %v113_v32 = vrot.slane %v42_v31, %v66_v5  ;;  %v117_v33 = vrot.slane %v42_v31, %v70_v6  ;;  %v128_v41 = vrot.slane %v44_v34, %v66_v5  ;;  %v132_v42 = vrot.slane %v44_v34, %v70_v6  ;;  %p216_p2 = scmp.ne.s32.totalorder %s155_s8, %s215_s9  ;;  %p221_p4 = scmp.lt.s32.totalorder %s215_s9, %s215_s9 }
  0x2e   :  { %p222_p5 = por %p221_p4, %p220_p3 }
  0x30   :  { %p223_p6 = pnand %p222_p5, %p216_p2 }
  0x98   :  { %v55_v8 = vpop.permute.xlu1 %54  ;;  %v46_v9 = vpop.permute.xlu0 %45 }
  0x9c   :  { %v57_v15 = vpop.permute.xlu1 %56  ;;  %v48_v17 = vpop.permute.xlu0 %47 }
  0x9d   :  { %v59_v19 = vsel %vm58_vm0, %v55_v8, %v57_v15  ;;  %v60_v20 = vsel %vm58_vm0, %v57_v15, %v55_v8  ;;  %v52_v21 = vsel %vm51_vm1, %v46_v9, %v48_v17  ;;  %v53_v22 = vsel %vm51_vm1, %v48_v17, %v46_v9 }
  0x9e   :  { %v74_v23 = vmul.f32 %v67_v11, %v53_v22  ;;  %v75_v24 = vmul.f32 %v71_v12, %v52_v21  ;;  %v89_v25 = vmul.f32 %v82_v13, %v59_v19  ;;  %v90_v26 = vmul.f32 %v86_v14, %v60_v20 }
  0xa0   :  { %v76_v27 = vadd.f32 %v74_v23, %v61_v18  ;;  %v77_v28 = vadd.f32 %v75_v24, %v62_v16 }
  0xa2   :  { %v92_v29 = vadd.f32 %v90_v26, %v77_v28  ;;  %v91_v30 = vadd.f32 %v89_v25, %v76_v27 }
  0xa4   :  { %95 = vrot.lane.b32.xlu1 %v92_v29, %s247_s1  ;;  %93 = vrot.lane.b32.xlu0 %v91_v30, %s247_s1  ;;  %v108_v43 = vmul.f32 0.38439733, %v92_v29  ;;  %v107_v44 = vmul.f32 0.38439733, %v91_v30 }
  0xa8   :  { %102 = vrot.lane.b32.xlu1 %v92_v29, %s248_s6  ;;  %100 = vrot.lane.b32.xlu0 %v91_v30, %s248_s6 }
 0x116   :  { %v96_v35 = vpop.permute.xlu1 %95  ;;  %v94_v36 = vpop.permute.xlu0 %93 }
 0x117   :  { %v98_v37 = vsel %vm97_vm2, %v94_v36, %v96_v35  ;;  %v99_v38 = vsel %vm97_vm2, %v96_v35, %v94_v36 }
 0x118   :  { %v120_v39 = vmul.f32 %v113_v32, %v99_v38  ;;  %v121_v40 = vmul.f32 %v117_v33, %v98_v37 }
 0x11a   :  { %v103_v45 = vpop.permute.xlu1 %102  ;;  %v101_v46 = vpop.permute.xlu0 %100  ;;  %v122_v49 = vadd.f32 %v120_v39, %v107_v44  ;;  %v123_v50 = vadd.f32 %v121_v40, %v108_v43 }
 0x11b   :  { %v105_v47 = vsel %vm104_vm3, %v101_v46, %v103_v45  ;;  %v106_v48 = vsel %vm104_vm3, %v103_v45, %v101_v46 }
 0x11c   :  { %v135_v51 = vmul.f32 %v128_v41, %v105_v47  ;;  %v136_v52 = vmul.f32 %v132_v42, %v106_v48 }
 0x11e   :  { %v137_v53 = vadd.f32 %v135_v51, %v122_v49  ;;  %v138_v54 = vadd.f32 %v136_v52, %v123_v50 }
 0x120   :  { %v139_v55 = vsub.f32 %v289_v0, %v137_v53  ;;  %v140_v56 = vsub.f32 %v293_v1, %v138_v54 }
 0x122   :  { %v141_v57 = vmul.f32 %v139_v55, %v289_v0  ;;  %v142_v58 = vmul.f32 %v140_v56, %v293_v1 }
 0x124   :  { %v145_v59 = vadd.f32 %v142_v58, %v141_v57 }
 0x126   :  { %v146_v60 = vmul.f32 0.5, %v145_v59 }
 0x128   :  { %147 = vst [vmem:[#allocation7] sm:$0xff] %v146_v60 }
 0x129   :  { %226 = shalt.err (!%p223_p6)
}
 0x12a   :  { %s227_s12 = scalar_lea.hbm %s317_s2, 128 }
 0x12b   :  { %p228_p7 = scmp.ne.s32.totalorder %s317_s2, %s227_s12  ;;  %p231_p8 = scmp.lt.u32.totalorder %s227_s12, %s317_s2 }
 0x12d   :  { %p233_p9 = pnand %p231_p8, %p228_p7 }
 0x12f   :  { %236 = shalt.err (!%p233_p9)
}
 0x130   :  { %157 = dma.vmem_to_hbm [thread:$0]  %s155_s8, 128, %s317_s2, [#allocation4]  }
 0x131   :  { %241 = dma.done.wait [#allocation4], 128  }
 0x132   :  { %242 = vsyncadd [#allocation4], 4294967168 }
 0x133   :  { %161 = vsyncpa [#allocation3], 1 }
 0x134   :  { %162 = vsyncpa [#allocation6], 1 }
 0x135   :  { %163 = vsyncpa [#allocation4], 1 }

</bundles_post_ra>
